<compile_context>
chip_gen: v5e
topology: v5e:2x2
jax: 0.10.0
libtpu: 0.0.40
codegen_flags: <defaults>
</compile_context>

<pallas_src>
import functools

import jax
import jax.numpy as jnp
from jax import lax
from jax.experimental import pallas as pl
from jax.experimental.pallas import tpu as pltpu


def _round_up(x, m):
    return (x + m - 1) // m * m


# ------------------------------ fused kernel -------------------------------- #
def fused_decoder_kernel(
    x_ref,       # (Bp, Ep)      f32   embedded decoder input        (resident)
    h_ref,       # (Bp, Hp)      f32   previous GRU hidden state     (resident)
    enc_ref,     # (Bp, Sp, Hp)  bf16  encoder outputs               (resident)
    wih_ref,     # (Ep, 3Hp)     bf16  GRU W_ih^T, gate blocks r|z|n (resident)
    whh_ref,     # (Hp, 3Hp)     bf16  GRU W_hh^T                    (resident)
    bih_ref,     # (1, 3Hp)      f32
    bhh_ref,     # (1, 3Hp)      f32
    wattn_ref,   # (Hp, Hp)      bf16  attention Linear W^T          (resident)
    battn_ref,   # (1, Hp)       f32
    wdense_ref,  # (Hp, TILE_V)  bf16  streamed vocab tile of dense W^T
    bdense_ref,  # (1, TILE_V)   f32   streamed bias tile
    logits_ref,  # out: (Bp, TILE_V) f32
    hnew_ref,    # out: (1, Bp, Hp)  f32  (one replicated block per vocab tile)
    *, s_len,
):
    x = x_ref[...].astype(jnp.bfloat16)
    h = h_ref[...]                       # keep f32 for the (1-z)*n + z*h blend
    enc = enc_ref[...]                   # bf16
    Hp = h.shape[-1]

    # ---- GRU cell (PyTorch gate order r|z|n), bf16 weights, f32 accumulation ---
    gi = jnp.dot(x, wih_ref[...], preferred_element_type=jnp.float32) + bih_ref[...]
    gh = jnp.dot(h.astype(jnp.bfloat16), whh_ref[...],
                 preferred_element_type=jnp.float32) + bhh_ref[...]
    # Hp is a multiple of 128 -> gate slices are lane-aligned.
    i_r, i_z, i_n = gi[:, 0:Hp], gi[:, Hp:2 * Hp], gi[:, 2 * Hp:3 * Hp]
    h_r, h_z, h_n = gh[:, 0:Hp], gh[:, Hp:2 * Hp], gh[:, 2 * Hp:3 * Hp]
    r = jax.nn.sigmoid(i_r + h_r)
    z = jax.nn.sigmoid(i_z + h_z)
    n = jnp.tanh(i_n + r * h_n)
    h_new = (1.0 - z) * n + z * h                                     # (Bp, Hp) f32
    hnew_ref[...] = h_new[None, :, :]

    # ---- Luong 'general' attention -----------------------------------------
    q = jnp.dot(h_new.astype(jnp.bfloat16), wattn_ref[...],
                preferred_element_type=jnp.float32) + battn_ref[...]  # (Bp, Hp)
    # score on the VPU (multiply + lane reduce) — avoids the XLU transpose the
    # 'bqh,bsh->bqs' einsum would need (contraction over the RHS's last dim).
    score = jnp.sum(q[:, None, :] * enc, axis=-1)                     # (Bp, Sp) f32

    # mask padded source positions, softmax over the source axis (exact recip)
    s_ids = lax.broadcasted_iota(jnp.int32, score.shape, 1)
    score = jnp.where(s_ids < s_len, score, -1e30)
    score = score - jnp.max(score, axis=-1, keepdims=True)
    p = jnp.exp(score)
    attn = p / jnp.sum(p, axis=-1, keepdims=True)                     # (Bp, Sp)

    # context via a sublane reduce — no transpose, no 3D->2D reshape
    ctx = jnp.sum(attn[:, :, None] * enc, axis=1)                     # (Bp, Hp) f32

    # ---- vocab-tile dense projection (the dominant, HBM-streaming part) ----
    logits_ref[...] = (
        jnp.dot(ctx.astype(jnp.bfloat16), wdense_ref[...],
                preferred_element_type=jnp.float32)
        + bdense_ref[...]
    )


# ------------------------------ parameter packing --------------------------- #
def pack_params(params):
    """Pre-transpose / pad / cast parameters to the kernel device layout."""
    E = params["embedding"].shape[1]
    H = params["w_hh"].shape[1]
    V = params["w_dense"].shape[0]
    Ep, Hp, Vp = _round_up(E, 128), _round_up(H, 128), _round_up(V, 128)

    def pad2(a, r, c):
        return jnp.pad(a, ((0, r - a.shape[0]), (0, c - a.shape[1])))

    def pad_gate_cols(w_t, rows_p):            # (in, 3H) -> (rows_p, 3Hp)
        gates = jnp.split(w_t, 3, axis=1)
        return jnp.concatenate([pad2(g, rows_p, Hp) for g in gates], axis=1)

    def pad_gate_bias(b):                      # (1, 3H) -> (1, 3Hp)
        gates = jnp.split(b, 3, axis=1)
        return jnp.concatenate(
            [jnp.pad(g, ((0, 0), (0, Hp - H))) for g in gates], axis=1)

    arrays = {
        "embedding": jnp.pad(params["embedding"], ((0, 0), (0, Ep - E))),
        # HBM-bound prologue weights in bf16 (f32 accumulation in-kernel)
        "w_ih_t": pad_gate_cols(params["w_ih"].T, Ep).astype(jnp.bfloat16),
        "w_hh_t": pad_gate_cols(params["w_hh"].T, Hp).astype(jnp.bfloat16),
        "b_ih": pad_gate_bias(params["b_ih"]),               # (1, 3Hp) f32
        "b_hh": pad_gate_bias(params["b_hh"]),               # (1, 3Hp) f32
        "w_attn_t": pad2(params["w_attn"].T, Hp, Hp).astype(jnp.bfloat16),
        "b_attn": jnp.pad(params["b_attn"], ((0, 0), (0, Hp - H))),
        # dominant-bytes operand: pre-transposed + bf16, streamed in vocab tiles
        "w_dense_t": pad2(params["w_dense"].T, Hp, Vp).astype(jnp.bfloat16),
        "b_dense": jnp.pad(params["b_dense"], ((0, 0), (0, Vp - V))),
    }
    dims = (E, H, V, Ep, Hp, Vp)               # static python ints
    return arrays, dims


def _pick_tile_v(Vp, Hp, Bp, resident_bytes, max_tile_v=8192):
    """Largest lane-dense vocab tile whose double-buffered working set fits a
    v7x-safe budget (64 MiB physical VMEM/TC); prefers an even grid length >= 2
    so the 'parallel' vocab axis splits evenly across both v7x TensorCores."""
    budget = 24 * 1024 * 1024

    def fits(tv):
        streamed = 2 * (Hp * tv * 2        # bf16 weight tile
                        + tv * 4           # f32 bias tile
                        + Bp * tv * 4      # f32 logits tile
                        + Bp * Hp * 4)     # f32 replicated h_new block
        return resident_bytes + streamed <= budget

    cands = [c for c in (8192, 4096, 2048, 1024, 512, 256, 128)
             if c <= max_tile_v and Vp % c == 0 and fits(c)]
    for c in cands:                        # even grid length first (v7x megacore)
        if (Vp // c) >= 2 and (Vp // c) % 2 == 0:
            return c
    for c in cands:
        if (Vp // c) >= 2:
            return c
    return cands[0] if cands else 128


# ------------------------------ decoder step -------------------------------- #
def luong_attention_decoder_step(x_tok, state, encoder_outputs, arrays, dims,
                                 *, max_tile_v=8192):
    """One Luong-'general' GRU decoder step.

    Args:
      x_tok:           (B, 1) int32 token ids
      state:           (1, B, H) previous hidden state
      encoder_outputs: (B, S, H) f32
      arrays, dims:    output of pack_params(params); dims is static.

    Returns:
      output: (B, 1, V) logits, state: (1, B, H)
    """
    _, H, V, Ep, Hp, Vp = dims
    B = x_tok.shape[0]
    S = encoder_outputs.shape[1]
    Bp = _round_up(B, 8)
    Sp = _round_up(S, 8)

    # plain-JAX glue: embedding gather + sublane/lane padding + bf16 enc
    x_emb = arrays["embedding"][x_tok[:, 0]]                         # (B, Ep) f32
    x_emb = jnp.pad(x_emb, ((0, Bp - B), (0, 0)))
    h_prev = jnp.pad(state[0], ((0, Bp - B), (0, Hp - H)))
    enc = jnp.pad(encoder_outputs,
                  ((0, Bp - B), (0, Sp - S), (0, Hp - H))).astype(jnp.bfloat16)

    # VMEM-resident prologue operands (constant index maps -> DMA'd once);
    # counted double-buffered for the tile-size budget.
    resident = 2 * (Bp * Ep * 4 + Bp * Hp * 4 + Bp * Sp * Hp * 2
                    + Ep * 3 * Hp * 2 + Hp * 3 * Hp * 2 + Hp * Hp * 2
                    + 2 * 3 * Hp * 4 + Hp * 4)
    tv = _pick_tile_v(Vp, Hp, Bp, resident, max_tile_v)
    n_tiles = Vp // tv

    def const(shape):
        nd = len(shape)
        return pl.BlockSpec(shape, lambda j: (0,) * nd)

    cost = pl.CostEstimate(
        flops=(2 * Bp * Hp * Vp
               + n_tiles * (2 * Bp * (Ep + Hp) * 3 * Hp + 4 * Bp * Sp * Hp)),
        transcendentals=n_tiles * Bp * (3 * Hp + Sp),
        bytes_accessed=(Hp * Vp * 2 + Vp * 4 + Bp * Vp * 4
                        + Bp * Sp * Hp * 2 + (Ep + Hp) * 3 * Hp * 2 + Hp * Hp * 2
                        + n_tiles * Bp * Hp * 4),
    )

    logits, h_rep = pl.pallas_call(
        functools.partial(fused_decoder_kernel, s_len=S),
        out_shape=(
            jax.ShapeDtypeStruct((Bp, Vp), jnp.float32),             # logits
            jax.ShapeDtypeStruct((n_tiles, Bp, Hp), jnp.float32),    # h_new (rep.)
        ),
        grid=(n_tiles,),
        in_specs=[
            const((Bp, Ep)),               # x_emb           (resident)
            const((Bp, Hp)),               # h_prev          (resident)
            const((Bp, Sp, Hp)),           # encoder outputs (resident, bf16)
            const((Ep, 3 * Hp)),           # w_ih^T          (resident, bf16)
            const((Hp, 3 * Hp)),           # w_hh^T          (resident, bf16)
            const((1, 3 * Hp)),            # b_ih
            const((1, 3 * Hp)),            # b_hh
            const((Hp, Hp)),               # w_attn^T        (resident, bf16)
            const((1, Hp)),                # b_attn
            pl.BlockSpec((Hp, tv), lambda j: (0, j)),   # streamed bf16 W_dense tile
            pl.BlockSpec((1, tv), lambda j: (0, j)),    # streamed bias tile
        ],
        out_specs=(
            pl.BlockSpec((Bp, tv), lambda j: (0, j)),       # lane-dense logits
            pl.BlockSpec((1, Bp, Hp), lambda j: (j, 0, 0)),  # h_new per tile
        ),
        compiler_params=pltpu.CompilerParams(
            dimension_semantics=("parallel",),   # v7x: split vocab tiles over 2 TCs
            vmem_limit_bytes=32 * 1024 * 1024),
        cost_estimate=cost,
    )(x_emb, h_prev, enc,
      arrays["w_ih_t"], arrays["w_hh_t"], arrays["b_ih"], arrays["b_hh"],
      arrays["w_attn_t"], arrays["b_attn"],
      arrays["w_dense_t"], arrays["b_dense"])

    output = logits[:B, None, :V]          # strip padding -> (B, 1, V)
    new_state = h_rep[0, :B, :H][None]     # (1, B, H)
    return output, new_state


# --------------------------- deterministic params --------------------------- #
def xavier_uniform(key, shape):
    fan_out, fan_in = shape
    bound = (6.0 / (fan_in + fan_out)) ** 0.5
    return jax.random.uniform(key, shape, jnp.float32, -bound, bound)


def init_params(key, vocab_size, embed_dim, hidden_dim, pad_idx=0):
    ks = jax.random.split(key, 6)
    emb = 0.1 * jax.random.normal(ks[0], (vocab_size, embed_dim), jnp.float32)
    emb = emb.at[pad_idx].set(0.0)                       # padding_idx row = 0
    return {
        "embedding": emb,
        # GRU weights: xavier_uniform, biases: 0 (per reset_parameters)
        "w_ih": xavier_uniform(ks[1], (3 * hidden_dim, embed_dim)),
        "w_hh": xavier_uniform(ks[2], (3 * hidden_dim, hidden_dim)),
        "b_ih": jnp.zeros((1, 3 * hidden_dim), jnp.float32),
        "b_hh": jnp.zeros((1, 3 * hidden_dim), jnp.float32),
        # attention Linear
        "w_attn": xavier_uniform(ks[3], (hidden_dim, hidden_dim)),
        "b_attn": 0.01 * jax.random.normal(ks[4], (1, hidden_dim), jnp.float32),
        # dense Linear: xavier_uniform weight, zero bias
        "w_dense": xavier_uniform(ks[5], (vocab_size, hidden_dim)),
        "b_dense": jnp.zeros((1, vocab_size), jnp.float32),
    }


# ----------------------------- pure-JAX reference --------------------------- #
def reference_step(x_tok, state, encoder_outputs, params):
    H = params["w_hh"].shape[1]
    xt = params["embedding"][x_tok[:, 0]]
    hp = state[0]
    gi = xt @ params["w_ih"].T + params["b_ih"][0]
    gh = hp @ params["w_hh"].T + params["b_hh"][0]
    i_r, i_z, i_n = gi[:, :H], gi[:, H:2 * H], gi[:, 2 * H:]
    h_r, h_z, h_n = gh[:, :H], gh[:, H:2 * H], gh[:, 2 * H:]
    r = jax.nn.sigmoid(i_r + h_r)
    z = jax.nn.sigmoid(i_z + h_z)
    n = jnp.tanh(i_n + r * h_n)
    hn = (1.0 - z) * n + z * hp
    out = hn[:, None, :]
    attn_w = out @ params["w_attn"].T + params["b_attn"][0]
    score = jnp.einsum('bqh,bsh->bqs', attn_w, encoder_outputs)
    attn = jax.nn.softmax(score, axis=-1)
    ctx = jnp.einsum('bqs,bsh->bqh', attn, encoder_outputs)
    logits = ctx @ params["w_dense"].T + params["b_dense"][0]
    return logits, hn[None]


# ---------------------------------- main ------------------------------------ #
if __name__ == "__main__":
    B, S, E, H, V = 2, 8, 32, 32, 64    # batch, src_seq_len, embed, hidden, vocab

    key = jax.random.PRNGKey(0)
    k_p, k_x, k_h, k_e = jax.random.split(key, 4)

    params = init_params(k_p, V, E, H, pad_idx=0)
    arrays, dims = pack_params(params)

    x_tok = jax.random.randint(k_x, (B, 1), 1, V, dtype=jnp.int32)      # (B, 1)
    state0 = jax.random.normal(k_h, (1, B, H), jnp.float32)             # (L, B, H)
    enc_out = jax.random.normal(k_e, (B, S, H), jnp.float32)            # (B, S, H)

    step = jax.jit(luong_attention_decoder_step,
                   static_argnames=("dims", "max_tile_v"))
    output, state = step(x_tok, state0, enc_out, arrays, dims=dims)
    jax.block_until_ready((output, state))

    assert output.shape == (B, 1, V) and state.shape == (1, B, H)

    # correctness check vs pure-JAX f32 reference (loose tolerance: all weight
    # matrices and the encoder outputs are streamed as bf16 in the kernel)
    ref_out, ref_state = reference_step(x_tok, state0, enc_out, params)
    assert jnp.allclose(state, ref_state, atol=2e-2, rtol=2e-2), "hidden mismatch"
    assert jnp.allclose(output, ref_out, atol=8e-2, rtol=5e-2), "logits mismatch"

    print("KERNEL_OK")
</pallas_src>

<mosaic_0001>
module attributes {stable_mosaic.version = 11 : i64} {
  func.func @fused_decoder_kernel(%arg0: i32, %arg1: memref<8x128xf32, #tpu.memory_space<vmem>>, %arg2: memref<8x128xf32, #tpu.memory_space<vmem>>, %arg3: memref<8x8x128xbf16, #tpu.memory_space<vmem>>, %arg4: memref<128x384xbf16, #tpu.memory_space<vmem>>, %arg5: memref<128x384xbf16, #tpu.memory_space<vmem>>, %arg6: memref<1x384xf32, #tpu.memory_space<vmem>>, %arg7: memref<1x384xf32, #tpu.memory_space<vmem>>, %arg8: memref<128x128xbf16, #tpu.memory_space<vmem>>, %arg9: memref<1x128xf32, #tpu.memory_space<vmem>>, %arg10: memref<128x128xbf16, #tpu.memory_space<vmem>>, %arg11: memref<1x128xf32, #tpu.memory_space<vmem>>, %arg12: memref<8x128xf32, #tpu.memory_space<vmem>>, %arg13: memref<1x8x128xf32, #tpu.memory_space<vmem>>) attributes {dimension_semantics = [#tpu.dimension_semantics<parallel>], iteration_bounds = array<i64: 1>, scalar_prefetch = 0 : i64, scratch_operands = 0 : i64, tpu.core_type = #tpu.core_type<tc>, window_params = [{pipeline_mode = #tpu.pipeline_mode<synchronous>, transform_indices = @transform_0, window_bounds = array<i64: 8, 128>}, {pipeline_mode = #tpu.pipeline_mode<synchronous>, transform_indices = @transform_1, window_bounds = array<i64: 8, 128>}, {pipeline_mode = #tpu.pipeline_mode<synchronous>, transform_indices = @transform_2, window_bounds = array<i64: 8, 8, 128>}, {pipeline_mode = #tpu.pipeline_mode<synchronous>, transform_indices = @transform_3, window_bounds = array<i64: 128, 384>}, {pipeline_mode = #tpu.pipeline_mode<synchronous>, transform_indices = @transform_4, window_bounds = array<i64: 128, 384>}, {pipeline_mode = #tpu.pipeline_mode<synchronous>, transform_indices = @transform_5, window_bounds = array<i64: 1, 384>}, {pipeline_mode = #tpu.pipeline_mode<synchronous>, transform_indices = @transform_6, window_bounds = array<i64: 1, 384>}, {pipeline_mode = #tpu.pipeline_mode<synchronous>, transform_indices = @transform_7, window_bounds = array<i64: 128, 128>}, {pipeline_mode = #tpu.pipeline_mode<synchronous>, transform_indices = @transform_8, window_bounds = array<i64: 1, 128>}, {transform_indices = @transform_9, window_bounds = array<i64: 128, 128>}, {transform_indices = @transform_10, window_bounds = array<i64: 1, 128>}, {transform_indices = @transform_11, window_bounds = array<i64: 8, 128>}, {transform_indices = @transform_12, window_bounds = array<i64: 1, 8, 128>}]} {
    %c0 = arith.constant 0 : index
    %c0_0 = arith.constant 0 : index
    %0 = vector.load %arg1[%c0, %c0_0] : memref<8x128xf32, #tpu.memory_space<vmem>>, vector<8x128xf32>
    %1 = arith.truncf %0 : vector<8x128xf32> to vector<8x128xbf16>
    %c0_1 = arith.constant 0 : index
    %c0_2 = arith.constant 0 : index
    %2 = vector.load %arg2[%c0_1, %c0_2] : memref<8x128xf32, #tpu.memory_space<vmem>>, vector<8x128xf32>
    %c0_3 = arith.constant 0 : index
    %c0_4 = arith.constant 0 : index
    %c0_5 = arith.constant 0 : index
    %3 = vector.load %arg3[%c0_3, %c0_4, %c0_5] : memref<8x8x128xbf16, #tpu.memory_space<vmem>>, vector<8x8x128xbf16>
    %c0_6 = arith.constant 0 : index
    %c0_7 = arith.constant 0 : index
    %4 = vector.load %arg4[%c0_6, %c0_7] : memref<128x384xbf16, #tpu.memory_space<vmem>>, vector<128x384xbf16>
    %cst = arith.constant dense<0.000000e+00> : vector<8x384xf32>
    %5 = tpu.matmul %1, %4, %cst {dimension_numbers = #tpu.dot_dimension_numbers<[1], [0], [0], [1], [0, 0, 1, 1], [], []>} : vector<8x128xbf16>, vector<128x384xbf16>, vector<8x384xf32> -> vector<8x384xf32>
    %c0_8 = arith.constant 0 : index
    %c0_9 = arith.constant 0 : index
    %6 = vector.load %arg6[%c0_8, %c0_9] : memref<1x384xf32, #tpu.memory_space<vmem>>, vector<1x384xf32>
    %7 = vector.broadcast %6 : vector<1x384xf32> to vector<8x384xf32>
    %8 = arith.addf %5, %7 : vector<8x384xf32>
    %9 = arith.truncf %2 : vector<8x128xf32> to vector<8x128xbf16>
    %c0_10 = arith.constant 0 : index
    %c0_11 = arith.constant 0 : index
    %10 = vector.load %arg5[%c0_10, %c0_11] : memref<128x384xbf16, #tpu.memory_space<vmem>>, vector<128x384xbf16>
    %cst_12 = arith.constant dense<0.000000e+00> : vector<8x384xf32>
    %11 = tpu.matmul %9, %10, %cst_12 {dimension_numbers = #tpu.dot_dimension_numbers<[1], [0], [0], [1], [0, 0, 1, 1], [], []>} : vector<8x128xbf16>, vector<128x384xbf16>, vector<8x384xf32> -> vector<8x384xf32>
    %c0_13 = arith.constant 0 : index
    %c0_14 = arith.constant 0 : index
    %12 = vector.load %arg7[%c0_13, %c0_14] : memref<1x384xf32, #tpu.memory_space<vmem>>, vector<1x384xf32>
    %13 = vector.broadcast %12 : vector<1x384xf32> to vector<8x384xf32>
    %14 = arith.addf %11, %13 : vector<8x384xf32>
    %15 = vector.extract_strided_slice %8 {offsets = [0, 0], sizes = [8, 128], strides = [1, 1]} : vector<8x384xf32> to vector<8x128xf32>
    %16 = vector.extract_strided_slice %8 {offsets = [0, 128], sizes = [8, 128], strides = [1, 1]} : vector<8x384xf32> to vector<8x128xf32>
    %17 = vector.extract_strided_slice %8 {offsets = [0, 256], sizes = [8, 128], strides = [1, 1]} : vector<8x384xf32> to vector<8x128xf32>
    %18 = vector.extract_strided_slice %14 {offsets = [0, 0], sizes = [8, 128], strides = [1, 1]} : vector<8x384xf32> to vector<8x128xf32>
    %19 = vector.extract_strided_slice %14 {offsets = [0, 128], sizes = [8, 128], strides = [1, 1]} : vector<8x384xf32> to vector<8x128xf32>
    %20 = vector.extract_strided_slice %14 {offsets = [0, 256], sizes = [8, 128], strides = [1, 1]} : vector<8x384xf32> to vector<8x128xf32>
    %21 = arith.addf %15, %18 : vector<8x128xf32>
    %22 = arith.negf %21 : vector<8x128xf32>
    %23 = math.exp %22 : vector<8x128xf32>
    %cst_15 = arith.constant 1.000000e+00 : f32
    %24 = vector.broadcast %cst_15 : f32 to vector<8x128xf32>
    %25 = arith.addf %24, %23 : vector<8x128xf32>
    %26 = arith.divf %24, %25 : vector<8x128xf32>
    %27 = arith.addf %16, %19 : vector<8x128xf32>
    %28 = arith.negf %27 : vector<8x128xf32>
    %29 = math.exp %28 : vector<8x128xf32>
    %cst_16 = arith.constant 1.000000e+00 : f32
    %30 = vector.broadcast %cst_16 : f32 to vector<8x128xf32>
    %31 = arith.addf %30, %29 : vector<8x128xf32>
    %32 = arith.divf %30, %31 : vector<8x128xf32>
    %33 = arith.mulf %26, %20 : vector<8x128xf32>
    %34 = arith.addf %17, %33 : vector<8x128xf32>
    %35 = math.tanh %34 : vector<8x128xf32>
    %cst_17 = arith.constant 1.000000e+00 : f32
    %36 = vector.broadcast %cst_17 : f32 to vector<8x128xf32>
    %37 = arith.subf %36, %32 : vector<8x128xf32>
    %38 = arith.mulf %37, %35 : vector<8x128xf32>
    %39 = arith.mulf %32, %2 : vector<8x128xf32>
    %40 = arith.addf %38, %39 : vector<8x128xf32>
    %41 = vector.shape_cast %40 : vector<8x128xf32> to vector<1x8x128xf32>
    %c0_18 = arith.constant 0 : index
    %c0_19 = arith.constant 0 : index
    %c0_20 = arith.constant 0 : index
    %42 = vector.load %arg13[%c0_18, %c0_19, %c0_20] : memref<1x8x128xf32, #tpu.memory_space<vmem>>, vector<1x8x128xf32>
    tpu.vector_store %arg13[%c0_18, %c0_19, %c0_20], %41 {strides = array<i32>} : memref<1x8x128xf32, #tpu.memory_space<vmem>>, vector<1x8x128xf32>,
    %43 = arith.truncf %40 : vector<8x128xf32> to vector<8x128xbf16>
    %c0_21 = arith.constant 0 : index
    %c0_22 = arith.constant 0 : index
    %44 = vector.load %arg8[%c0_21, %c0_22] : memref<128x128xbf16, #tpu.memory_space<vmem>>, vector<128x128xbf16>
    %cst_23 = arith.constant dense<0.000000e+00> : vector<8x128xf32>
    %45 = tpu.matmul %43, %44, %cst_23 {dimension_numbers = #tpu.dot_dimension_numbers<[1], [0], [0], [1], [0, 0, 1, 1], [], []>} : vector<8x128xbf16>, vector<128x128xbf16>, vector<8x128xf32> -> vector<8x128xf32>
    %c0_24 = arith.constant 0 : index
    %c0_25 = arith.constant 0 : index
    %46 = vector.load %arg9[%c0_24, %c0_25] : memref<1x128xf32, #tpu.memory_space<vmem>>, vector<1x128xf32>
    %47 = vector.broadcast %46 : vector<1x128xf32> to vector<8x128xf32>
    %48 = arith.addf %45, %47 : vector<8x128xf32>
    %49 = vector.shape_cast %48 : vector<8x128xf32> to vector<8x1x128xf32>
    %50 = arith.extf %3 : vector<8x8x128xbf16> to vector<8x8x128xf32>
    %51 = vector.broadcast %49 : vector<8x1x128xf32> to vector<8x8x128xf32>
    %52 = arith.mulf %51, %50 : vector<8x8x128xf32>
    %cst_26 = arith.constant dense<0.000000e+00> : vector<8x8xf32>
    %53 = vector.multi_reduction <add>, %52, %cst_26 [2] : vector<8x8x128xf32> to vector<8x8xf32>
    %54 = tpu.iota {dimensions = array<i32: 1>} : vector<8x8xi32>
    %c8_i32 = arith.constant 8 : i32
    %55 = vector.broadcast %c8_i32 : i32 to vector<8x8xi32>
    %56 = arith.cmpi slt, %54, %55 : vector<8x8xi32>
    %cst_27 = arith.constant -1.000000e+30 : f32
    %57 = vector.broadcast %cst_27 : f32 to vector<8x8xf32>
    %58 = arith.select %56, %53, %57 : vector<8x8xi1>, vector<8x8xf32>
    %cst_28 = arith.constant dense<0xFF800000> : vector<8xf32>
    %59 = vector.multi_reduction <maximumf>, %58, %cst_28 [1] : vector<8x8xf32> to vector<8xf32>
    %60 = vector.shape_cast %59 : vector<8xf32> to vector<8x1xf32>
    %61 = vector.broadcast %60 : vector<8x1xf32> to vector<8x8xf32>
    %62 = arith.subf %58, %61 : vector<8x8xf32>
    %63 = math.exp %62 : vector<8x8xf32>
    %cst_29 = arith.constant dense<0.000000e+00> : vector<8xf32>
    %64 = vector.multi_reduction <add>, %63, %cst_29 [1] : vector<8x8xf32> to vector<8xf32>
    %65 = vector.shape_cast %64 : vector<8xf32> to vector<8x1xf32>
    %66 = vector.broadcast %65 : vector<8x1xf32> to vector<8x8xf32>
    %67 = arith.divf %63, %66 : vector<8x8xf32>
    %68 = vector.shape_cast %67 : vector<8x8xf32> to vector<8x8x1xf32>
    %69 = arith.extf %3 : vector<8x8x128xbf16> to vector<8x8x128xf32>
    %70 = vector.broadcast %68 : vector<8x8x1xf32> to vector<8x8x128xf32>
    %71 = arith.mulf %70, %69 : vector<8x8x128xf32>
    %cst_30 = arith.constant dense<0.000000e+00> : vector<8x128xf32>
    %72 = vector.multi_reduction <add>, %71, %cst_30 [1] : vector<8x8x128xf32> to vector<8x128xf32>
    %73 = arith.truncf %72 : vector<8x128xf32> to vector<8x128xbf16>
    %c0_31 = arith.constant 0 : index
    %c0_32 = arith.constant 0 : index
    %74 = vector.load %arg10[%c0_31, %c0_32] : memref<128x128xbf16, #tpu.memory_space<vmem>>, vector<128x128xbf16>
    %cst_33 = arith.constant dense<0.000000e+00> : vector<8x128xf32>
    %75 = tpu.matmul %73, %74, %cst_33 {dimension_numbers = #tpu.dot_dimension_numbers<[1], [0], [0], [1], [0, 0, 1, 1], [], []>} : vector<8x128xbf16>, vector<128x128xbf16>, vector<8x128xf32> -> vector<8x128xf32>
    %c0_34 = arith.constant 0 : index
    %c0_35 = arith.constant 0 : index
    %76 = vector.load %arg11[%c0_34, %c0_35] : memref<1x128xf32, #tpu.memory_space<vmem>>, vector<1x128xf32>
    %77 = vector.broadcast %76 : vector<1x128xf32> to vector<8x128xf32>
    %78 = arith.addf %75, %77 : vector<8x128xf32>
    %c0_36 = arith.constant 0 : index
    %c0_37 = arith.constant 0 : index
    %79 = vector.load %arg12[%c0_36, %c0_37] : memref<8x128xf32, #tpu.memory_space<vmem>>, vector<8x128xf32>
    tpu.vector_store %arg12[%c0_36, %c0_37], %78 {strides = array<i32>} : memref<8x128xf32, #tpu.memory_space<vmem>>, vector<8x128xf32>,
    return
  }
  func.func @transform_0(%arg0: i32) -> (i32, i32) {
    %c0_i32 = arith.constant 0 : i32
    %c0_i32_0 = arith.constant 0 : i32
    %c0_i32_1 = arith.constant 0 : i32
    return %c0_i32, %c0_i32_0 : i32, i32
  }
  func.func @transform_1(%arg0: i32) -> (i32, i32) {
    %c0_i32 = arith.constant 0 : i32
    %c0_i32_0 = arith.constant 0 : i32
    %c0_i32_1 = arith.constant 0 : i32
    return %c0_i32, %c0_i32_0 : i32, i32
  }
  func.func @transform_2(%arg0: i32) -> (i32, i32, i32) {
    %c0_i32 = arith.constant 0 : i32
    %c0_i32_0 = arith.constant 0 : i32
    %c0_i32_1 = arith.constant 0 : i32
    %c0_i32_2 = arith.constant 0 : i32
    return %c0_i32, %c0_i32_0, %c0_i32_1 : i32, i32, i32
  }
  func.func @transform_3(%arg0: i32) -> (i32, i32) {
    %c0_i32 = arith.constant 0 : i32
    %c0_i32_0 = arith.constant 0 : i32
    %c0_i32_1 = arith.constant 0 : i32
    return %c0_i32, %c0_i32_0 : i32, i32
  }
  func.func @transform_4(%arg0: i32) -> (i32, i32) {
    %c0_i32 = arith.constant 0 : i32
    %c0_i32_0 = arith.constant 0 : i32
    %c0_i32_1 = arith.constant 0 : i32
    return %c0_i32, %c0_i32_0 : i32, i32
  }
  func.func @transform_5(%arg0: i32) -> (i32, i32) {
    %c0_i32 = arith.constant 0 : i32
    %c0_i32_0 = arith.constant 0 : i32
    %c0_i32_1 = arith.constant 0 : i32
    return %c0_i32, %c0_i32_0 : i32, i32
  }
  func.func @transform_6(%arg0: i32) -> (i32, i32) {
    %c0_i32 = arith.constant 0 : i32
    %c0_i32_0 = arith.constant 0 : i32
    %c0_i32_1 = arith.constant 0 : i32
    return %c0_i32, %c0_i32_0 : i32, i32
  }
  func.func @transform_7(%arg0: i32) -> (i32, i32) {
    %c0_i32 = arith.constant 0 : i32
    %c0_i32_0 = arith.constant 0 : i32
    %c0_i32_1 = arith.constant 0 : i32
    return %c0_i32, %c0_i32_0 : i32, i32
  }
  func.func @transform_8(%arg0: i32) -> (i32, i32) {
    %c0_i32 = arith.constant 0 : i32
    %c0_i32_0 = arith.constant 0 : i32
    %c0_i32_1 = arith.constant 0 : i32
    return %c0_i32, %c0_i32_0 : i32, i32
  }
  func.func @transform_9(%arg0: i32) -> (i32, i32) {
    %c0_i32 = arith.constant 0 : i32
    %c0_i32_0 = arith.constant 0 : i32
    return %c0_i32, %arg0 : i32, i32
  }
  func.func @transform_10(%arg0: i32) -> (i32, i32) {
    %c0_i32 = arith.constant 0 : i32
    %c0_i32_0 = arith.constant 0 : i32
    return %c0_i32, %arg0 : i32, i32
  }
  func.func @transform_11(%arg0: i32) -> (i32, i32) {
    %c0_i32 = arith.constant 0 : i32
    %c0_i32_0 = arith.constant 0 : i32
    return %c0_i32, %arg0 : i32, i32
  }
  func.func @transform_12(%arg0: i32) -> (i32, i32, i32) {
    %c0_i32 = arith.constant 0 : i32
    %c0_i32_0 = arith.constant 0 : i32
    %c0_i32_1 = arith.constant 0 : i32
    return %arg0, %c0_i32, %c0_i32_0 : i32, i32, i32
  }
}

</mosaic_0001>

<bundles_post_ra>
// kernel: luong_attention_decoder_step.1
= control target key start
LH: loop header
LB: loop body
LE: loop exit
PB: predicated region body
PF: predicated region fallthrough
CT: control target
= control target key end

     0   :  { %18 = vsyncpa [#allocation3], 0  ;;  %s1662_s0 = inlined_call_operand.vmem [shape: f32[8,128], index: 0, kind: input, shape index: {}]   ;;  %s1663_s1 = inlined_call_operand.vmem [shape: f32[8,128], index: 1, kind: input, shape index: {}]   ;;  %s1664_s2 = inlined_call_operand.vmem [shape: bf16[8,8,128], index: 2, kind: input, shape index: {}]   ;;  %s1665_s3 = inlined_call_operand.hbm [shape: bf16[128,384], index: 3, kind: input, shape index: {}]   ;;  %s1666_s4 = inlined_call_operand.hbm [shape: bf16[128,384], index: 4, kind: input, shape index: {}]   ;;  %s1667_s5 = inlined_call_operand.vmem [shape: f32[1,384], index: 5, kind: input, shape index: {}]   ;;  %s1668_s6 = inlined_call_operand.vmem [shape: f32[1,384], index: 6, kind: input, shape index: {}]   ;;  %s1669_s7 = inlined_call_operand.vmem [shape: bf16[128,128], index: 7, kind: input, shape index: {}]   ;;  %s1670_s8 = inlined_call_operand.vmem [shape: f32[1,128], index: 8, kind: input, shape index: {}]   ;;  %s1671_s9 = inlined_call_operand.hbm [shape: bf16[128,128], index: 9, kind: input, shape index: {}]   ;;  %s1672_s10 = inlined_call_operand.vmem [shape: f32[1,128], index: 10, kind: input, shape index: {}]   ;;  %s1673_s11 = inlined_call_operand.vmem [shape: f32[8,128], index: 11, kind: output, shape index: {0}]   ;;  %s1674_s12 = inlined_call_operand.vmem [shape: f32[1,8,128], index: 12, kind: output, shape index: {1}]  }
   0x1   :  { %19 = vsyncpa [#allocation5], 0  ;;  %s43_s23 = sshll.u32 %s1666_s4, 4  ;;  %s1439_s24 = smov [#allocation4]   ;;  %s44_s23 = int_to_ptr.hbm [resolvable:$true] %s43_s23 }
   0x2   :  { %s45_s25 = sshll.u32 %s1439_s24, 4  ;;  %s30_s28 = sshll.u32 %s1665_s3, 4  ;;  %s46_s25 = int_to_ptr.vmem [resolvable:$true] %s45_s25  ;;  %s31_s28 = int_to_ptr.hbm [resolvable:$true] %s30_s28 }
   0x3   :  { %s1440_s29 = smov 192   ;;  %s1441_s30 = smov 12  }
   0x4   :  { %51 = dma.hbm_to_vmem [thread:$0]  %s44_s23, 3072, %s46_s25, [#allocation5], %s1440_s29, %s1440_s29, %s1441_s30  }
   0x5   :  { %s1442_s13 = smov [#allocation2]   ;;  %s64_s17 = sshll.u32 %s1671_s9, 4  ;;  %s65_s17 = int_to_ptr.hbm [resolvable:$true] %s64_s17 }
   0x6   :  { %s32_s14 = sshll.u32 %s1442_s13, 4  ;;  %s1443_s4 = smov [#allocation6]   ;;  %s33_s14 = int_to_ptr.vmem [resolvable:$true] %s32_s14 }
   0x7   :  { %38 = dma.hbm_to_vmem [thread:$0]  %s31_s28, 3072, %s33_s14, [#allocation3], %s1440_s29, %s1440_s29, %s1441_s30  }
   0x8   :  { %s66_s18 = sshll.u32 %s1443_s4, 4  ;;  %s1444_s19 = smov 64   ;;  %s67_s18 = int_to_ptr.vmem [resolvable:$true] %s66_s18 }
   0x9   :  { %s1445_s20 = smov 4  }
   0xa   :  { %72 = dma.hbm_to_vmem [thread:$0]  %s65_s17, 1024, %s67_s18, [#allocation5], %s1444_s19, %s1444_s19, %s1445_s20  }
   0xb   :  { %1435 = dma.done.wait [#allocation3], 3072  }
   0xc   :  { %1436 = vsyncadd [#allocation3], 4294964224 }
   0xd   :  { %1437 = dma.done.wait [#allocation5], 4096  }
   0xe   :  { %1438 = vsyncadd [#allocation5], 4294963200  ;;  %v1082_v0 = vld [vmem:[#allocation2 + $0xa8] sm:$0xf]  ;;  %v1276_v1 = vld [vmem:[#allocation2 + $0xb0] sm:$0xf0] }
   0xf   :  { %v1178_v2 = vld [vmem:[#allocation4 + $0xa8] sm:$0xf]  ;;  %v1083_v3 = vor.u32 %v1276_v1, %v1082_v0  ;;  %v1300_v4 = vld [vmem:[#allocation4 + $0xb0] sm:$0xf0]  ;;  %v1070_v5 = vld [vmem:[#allocation2 + $0x90] sm:$0xf] }
  0x10   :  { %v1273_v6 = vld [vmem:[#allocation2 + $0x98] sm:$0xf0]  ;;  %v1179_v7 = vor.u32 %v1300_v4, %v1178_v2  ;;  %v1166_v8 = vld [vmem:[#allocation4 + $0x90] sm:$0xf]  ;;  %v1275_v10 = vld [vmem:[#allocation2 + $0xac] sm:$0xf] }
  0x11   :  { %v1297_v9 = vld [vmem:[#allocation4 + $0x98] sm:$0xf0]  ;;  %266 = vmatpush.bf16.msra.mxu0 %v1083_v3  ;;  %v1071_v11 = vor.u32 %v1273_v6, %v1070_v5  ;;  %v1084_v12 = vld [vmem:[#allocation2 + $0xb4] sm:$0xf0]  ;;  %v1270_v16 = vld [vmem:[#allocation2 + $0x80] sm:$0xf0] }
  0x12   :  { %474 = vmatpush.bf16.msra.mxu3 %v1179_v7  ;;  %v1167_v13 = vor.u32 %v1297_v9, %v1166_v8  ;;  %v1087_v14 = vor.u32 %v1275_v10, %v1084_v12  ;;  %v1058_v15 = vld [vmem:[#allocation2 + $0x78] sm:$0xf]  ;;  %v1272_v17 = vld [vmem:[#allocation2 + $0x94] sm:$0xf]  ;;  %v1294_v19 = vld [vmem:[#allocation4 + $0x80] sm:$0xf0] }
  0x13   :  { %v1154_v18 = vld [vmem:[#allocation4 + $0x78] sm:$0xf]  ;;  %v1072_v20 = vld [vmem:[#allocation2 + $0x9c] sm:$0xf0]  ;;  %v1059_v22 = vor.u32 %v1270_v16, %v1058_v15  ;;  %v1269_v23 = vld [vmem:[#allocation2 + $0x7c] sm:$0xf] }
  0x14   :  { %279 = vmatpush.bf16.msra.mxu1 %v1087_v14  ;;  %v1075_v21 = vor.u32 %v1272_v17, %v1072_v20  ;;  %v1060_v24 = vld [vmem:[#allocation2 + $0x84] sm:$0xf0]  ;;  %v1155_v25 = vor.u32 %v1294_v19, %v1154_v18  ;;  %v1046_v26 = vld [vmem:[#allocation2 + $0x60] sm:$0xf]  ;;  %v1267_v27 = vld [vmem:[#allocation2 + $0x68] sm:$0xf0] }
  0x15   :  { %267 = vmatpush.bf16.msra.mxu0 %v1071_v11  ;;  %v1142_v28 = vld [vmem:[#allocation4 + $0x60] sm:$0xf]  ;;  %v1291_v29 = vld [vmem:[#allocation4 + $0x68] sm:$0xf0]  ;;  %v1063_v30 = vor.u32 %v1269_v23, %v1060_v24  ;;  %v1047_v31 = vor.u32 %v1267_v27, %v1046_v26  ;;  %v1266_v32 = vld [vmem:[#allocation2 + $0x64] sm:$0xf] }
  0x16   :  { %475 = vmatpush.bf16.msra.mxu3 %v1167_v13  ;;  %v1048_v33 = vld [vmem:[#allocation2 + $0x6c] sm:$0xf0]  ;;  %v1143_v34 = vor.u32 %v1291_v29, %v1142_v28  ;;  %v1034_v35 = vld [vmem:[#allocation2 + $0x48] sm:$0xf]  ;;  %v1264_v36 = vld [vmem:[#allocation2 + $0x50] sm:$0xf0] }
  0x17   :  { %v1130_v37 = vld [vmem:[#allocation4 + $0x48] sm:$0xf]  ;;  %v1288_v38 = vld [vmem:[#allocation4 + $0x50] sm:$0xf0]  ;;  %v1051_v39 = vor.u32 %v1266_v32, %v1048_v33  ;;  %v1035_v40 = vor.u32 %v1264_v36, %v1034_v35  ;;  %v1022_v41 = vld [vmem:[#allocation2 + $0x30] sm:$0xf] }
  0x18   :  { %280 = vmatpush.bf16.msra.mxu1 %v1075_v21  ;;  %v1263_v42 = vld [vmem:[#allocation2 + $0x4c] sm:$0xf]  ;;  %v1036_v43 = vld [vmem:[#allocation2 + $0x54] sm:$0xf0]  ;;  %v1131_v44 = vor.u32 %v1288_v38, %v1130_v37  ;;  %v1261_v45 = vld [vmem:[#allocation2 + $0x38] sm:$0xf0] }
  0x19   :  { %268 = vmatpush.bf16.msra.mxu0 %v1059_v22  ;;  %v1090_v46 = vld [vmem:[#allocation2 + $0xb0] sm:$0xf]  ;;  %v1277_v47 = vld [vmem:[#allocation2 + $0xb8] sm:$0xf0]  ;;  %v1039_v51 = vor.u32 %v1263_v42, %v1036_v43  ;;  %v1078_v52 = vld [vmem:[#allocation2 + $0x98] sm:$0xf]  ;;  %v1023_v53 = vor.u32 %v1261_v45, %v1022_v41 }
  0x1a   :  { %476 = vmatpush.bf16.msra.mxu3 %v1155_v25  ;;  %v1118_v48 = vld [vmem:[#allocation4 + $0x30] sm:$0xf]  ;;  %v1285_v49 = vld [vmem:[#allocation4 + $0x38] sm:$0xf0]  ;;  %v1091_v50 = vor.u32 %v1277_v47, %v1090_v46  ;;  %v1260_v54 = vld [vmem:[#allocation2 + $0x34] sm:$0xf] }
  0x1b   :  { %v1024_v55 = vld [vmem:[#allocation2 + $0x3c] sm:$0xf0]  ;;  %v1274_v56 = vld [vmem:[#allocation2 + $0xa0] sm:$0xf0]  ;;  %v1119_v57 = vor.u32 %v1285_v49, %v1118_v48  ;;  %v1010_v58 = vld [vmem:[#allocation2 + $0x18] sm:$0xf] }
  0x1c   :  { %281 = vmatpush.bf16.msra.mxu1 %v1063_v30  ;;  %292 = vmatpush.bf16.msra.mxu2 %v1091_v50  ;;  %v1258_v59 = vld [vmem:[#allocation2 + $0x20] sm:$0xf0]  ;;  %v1079_v60 = vor.u32 %v1274_v56, %v1078_v52  ;;  %v1066_v61 = vld [vmem:[#allocation2 + $0x80] sm:$0xf]  ;;  %v1106_v62 = vld [vmem:[#allocation4 + $0x18] sm:$0xf]  ;;  %v1027_v1 = vor.u32 %v1260_v54, %v1024_v55 }
  0x1d   :  { %269 = vmatpush.bf16.msra.mxu0 %v1047_v31  ;;  %v1282_v63 = vld [vmem:[#allocation4 + $0x20] sm:$0xf0]  ;;  %v1271_v0 = vld [vmem:[#allocation2 + $0x88] sm:$0xf0]  ;;  %v998_v2 = vld [vmem:[#allocation2] sm:$0xf]  ;;  %v1011_v3 = vor.u32 %v1258_v59, %v1010_v58 }
  0x1e   :  { %477 = vmatpush.bf16.msra.mxu3 %v1143_v34  ;;  %v1255_v4 = vld [vmem:[#allocation2 + $0x8] sm:$0xf0]  ;;  %v1257_v5 = vld [vmem:[#allocation2 + $0x1c] sm:$0xf]  ;;  %v1012_v6 = vld [vmem:[#allocation2 + $0x24] sm:$0xf0]  ;;  %v1067_v7 = vor.u32 %v1271_v0, %v1066_v61  ;;  %v1107_v8 = vor.u32 %v1282_v63, %v1106_v62 }
  0x1f   :  { %v1094_v9 = vld [vmem:[#allocation4] sm:$0xf]  ;;  %v1054_v10 = vld [vmem:[#allocation2 + $0x68] sm:$0xf]  ;;  %v1268_v11 = vld [vmem:[#allocation2 + $0x70] sm:$0xf0]  ;;  %v1015_v15 = vor.u32 %v1257_v5, %v1012_v6  ;;  %v999_v17 = vor.u32 %v1255_v4, %v998_v2 }
  0x20   :  { %282 = vmatpush.bf16.msra.mxu1 %v1051_v39  ;;  %293 = vmatpush.bf16.msra.mxu2 %v1079_v60  ;;  %v1279_v12 = vld [vmem:[#allocation4 + $0x8] sm:$0xf0]  ;;  %v1180_v14 = vld [vmem:[#allocation4 + $0xb4] sm:$0xf0]  ;;  %v1523_v16 = vld [vmem:[%s1663_s1] sm:$0xff]  ;;  %v1055_v21 = vor.u32 %v1268_v11, %v1054_v10  ;;  %vm718_vm8 = vcmask 1041409  }
  0x21   :  { %270 = vmatpush.bf16.msra.mxu0 %v1035_v40  ;;  %v1299_v13 = vld [vmem:[#allocation4 + $0xac] sm:$0xf]  ;;  %v1254_v18 = vld [vmem:[#allocation2 + $0x4] sm:$0xf]  ;;  %v1000_v19 = vld [vmem:[#allocation2 + $0xc] sm:$0xf0]  ;;  %v1095_v22 = vor.u32 %v1279_v12, %v1094_v9  ;;  %v1532_v32 = vpack.c.bf16 %v1523_v16, %v1523_v16 }
  0x22   :  { %478 = vmatpush.bf16.msra.mxu3 %v1131_v44  ;;  %v87_v20 = vld [vmem:[%s1662_s0] sm:$0xff]  ;;  %v1183_v23 = vor.u32 %v1299_v13, %v1180_v14  ;;  %v1296_v24 = vld [vmem:[#allocation4 + $0x94] sm:$0xf]  ;;  %v1186_v25 = vld [vmem:[#allocation4 + $0xb0] sm:$0xf]  ;;  %v1003_v30 = vor.u32 %v1254_v18, %v1000_v19  ;;  %vm720_vm9 = vcmask 1042434  }
  0x23   :  { %v1301_v26 = vld [vmem:[#allocation4 + $0xb8] sm:$0xf0]  ;;  %v1168_v27 = vld [vmem:[#allocation4 + $0x9c] sm:$0xf0]  ;;  %v1042_v28 = vld [vmem:[#allocation2 + $0x50] sm:$0xf]  ;;  %v1528_v31 = vpack.c.bf16 %v87_v20, %v87_v20 }
  0x24   :  { %283 = vmatpush.bf16.msra.mxu1 %v1039_v51  ;;  %294 = vmatpush.bf16.msra.mxu2 %v1067_v7  ;;  %v1265_v29 = vld [vmem:[#allocation2 + $0x58] sm:$0xf0]  ;;  %v1187_v33 = vor.u32 %v1301_v26, %v1186_v25  ;;  %v1156_v35 = vld [vmem:[#allocation4 + $0x84] sm:$0xf0]  ;;  %v1171_v36 = vor.u32 %v1296_v24, %v1168_v27  ;;  %v1174_v37 = vld [vmem:[#allocation4 + $0x98] sm:$0xf] }
  0x25   :  { %271 = vmatpush.bf16.msra.mxu0 %v1023_v53  ;;  %v1293_v34 = vld [vmem:[#allocation4 + $0x7c] sm:$0xf]  ;;  %v1298_v38 = vld [vmem:[#allocation4 + $0xa0] sm:$0xf0]  ;;  %v1043_v39 = vor.u32 %v1265_v29, %v1042_v28  ;;  %v1030_v40 = vld [vmem:[#allocation2 + $0x38] sm:$0xf] }
  0x26   :  { %479 = vmatpush.bf16.msra.mxu3 %v1119_v57  ;;  %v1262_v41 = vld [vmem:[#allocation2 + $0x40] sm:$0xf0]  ;;  %v1175_v42 = vor.u32 %v1298_v38, %v1174_v37  ;;  %v1159_v43 = vor.u32 %v1293_v34, %v1156_v35  ;;  %v1162_v45 = vld [vmem:[#allocation4 + $0x80] sm:$0xf]  ;;  %v1295_v46 = vld [vmem:[#allocation4 + $0x88] sm:$0xf0] }
  0x27   :  { %v1290_v44 = vld [vmem:[#allocation4 + $0x64] sm:$0xf]  ;;  %v1031_v47 = vor.u32 %v1262_v41, %v1030_v40  ;;  %v1144_v48 = vld [vmem:[#allocation4 + $0x6c] sm:$0xf0]  ;;  %v1018_v49 = vld [vmem:[#allocation2 + $0x20] sm:$0xf]  ;;  %v1163_v51 = vor.u32 %v1295_v46, %v1162_v45 }
  0x28   :  { %284 = vmatpush.bf16.msra.mxu1 %v1027_v1  ;;  %295 = vmatpush.bf16.msra.mxu2 %v1055_v21  ;;  %v1259_v50 = vld [vmem:[#allocation2 + $0x28] sm:$0xf0]  ;;  %v1147_v52 = vor.u32 %v1290_v44, %v1144_v48  ;;  %v1150_v54 = vld [vmem:[#allocation4 + $0x68] sm:$0xf]  ;;  %v1292_v55 = vld [vmem:[#allocation4 + $0x70] sm:$0xf0] }
  0x29   :  { %272 = vmatpush.bf16.msra.mxu0 %v1011_v3  ;;  %v1287_v53 = vld [vmem:[#allocation4 + $0x4c] sm:$0xf]  ;;  %v1019_v56 = vor.u32 %v1259_v50, %v1018_v49  ;;  %v1132_v57 = vld [vmem:[#allocation4 + $0x54] sm:$0xf0]  ;;  %v1006_v58 = vld [vmem:[#allocation2 + $0x8] sm:$0xf]  ;;  %v1151_v60 = vor.u32 %v1292_v55, %v1150_v54 }
  0x2a   :  { %480 = vmatpush.bf16.msra.mxu3 %v1107_v8  ;;  %v1256_v59 = vld [vmem:[#allocation2 + $0x10] sm:$0xf0]  ;;  %v1135_v61 = vor.u32 %v1287_v53, %v1132_v57  ;;  %v1138_v62 = vld [vmem:[#allocation4 + $0x50] sm:$0xf]  ;;  %v1289_v63 = vld [vmem:[#allocation4 + $0x58] sm:$0xf0] }
  0x2b   :  { %v1007_v0 = vor.u32 %v1256_v59, %v1006_v58  ;;  %v1284_v1 = vld [vmem:[#allocation4 + $0x34] sm:$0xf]  ;;  %v1120_v2 = vld [vmem:[#allocation4 + $0x3c] sm:$0xf0]  ;;  %v1139_v3 = vor.u32 %v1289_v63, %v1138_v62  ;;  %v1126_v5 = vld [vmem:[#allocation4 + $0x38] sm:$0xf] }
  0x2c   :  { %285 = vmatpush.bf16.msra.mxu1 %v1015_v15  ;;  %296 = vmatpush.bf16.msra.mxu2 %v1043_v39  ;;  %v1123_v4 = vor.u32 %v1284_v1, %v1120_v2  ;;  %v1286_v6 = vld [vmem:[#allocation4 + $0x40] sm:$0xf0]  ;;  %v1281_v7 = vld [vmem:[#allocation4 + $0x1c] sm:$0xf]  ;;  %v1108_v8 = vld [vmem:[#allocation4 + $0x24] sm:$0xf0] }
  0x2d   :  { %273 = vmatpush.bf16.msra.mxu0 %v999_v17  ;;  %v1127_v9 = vor.u32 %v1286_v6, %v1126_v5  ;;  %v1111_v10 = vor.u32 %v1281_v7, %v1108_v8  ;;  %v1114_v11 = vld [vmem:[#allocation4 + $0x20] sm:$0xf]  ;;  %v1283_v12 = vld [vmem:[#allocation4 + $0x28] sm:$0xf0]  ;;  %v1278_v13 = vld [vmem:[#allocation4 + $0x4] sm:$0xf] }
  0x2e   :  { %481 = vmatpush.bf16.msra.mxu3 %v1095_v22  ;;  %v1096_v14 = vld [vmem:[#allocation4 + $0xc] sm:$0xf0]  ;;  %v1115_v15 = vor.u32 %v1283_v12, %v1114_v11  ;;  %v1102_v18 = vld [vmem:[#allocation4 + $0x8] sm:$0xf]  ;;  %v1280_v19 = vld [vmem:[#allocation4 + $0x10] sm:$0xf0] }
  0x2f   :  { %v1099_v17 = vor.u32 %v1278_v13, %v1096_v14  ;;  %v1103_v20 = vor.u32 %v1280_v19, %v1102_v18  ;;  %v1543_v21 = vld [vmem:[%s1667_s5] sm:$0x7]  ;;  %v1309_v28 = vld [vmem:[%s1669_s7 + $0x38] sm:$0xff]  ;;  %v1304_v44 = vld [vmem:[%s1669_s7 + $0x10] sm:$0xff]  ;;  %vm722_vm10 = vcmask 1043459   ;;  %vm724_vm11 = vcmask 1044484  }
  0x30   :  { %286 = vmatpush.bf16.msra.mxu1 %v1003_v30  ;;  %274 = vmatmul.bf16.vlgmr.msra.gmra.mxu0 %v1528_v31  ;;  %v132_v24 = vperm.slane %v1543_v21, 0  ;;  %v1306_v38 = vld [vmem:[%s1669_s7 + $0x20] sm:$0xff]  ;;  %v1305_v41 = vld [vmem:[%s1669_s7 + $0x18] sm:$0xff]  ;;  %v134_v6 = vperm.slane %v1543_v21, 2  ;;  %vm726_vm12 = vcmask 1045509   ;;  %vm728_vm13 = vcmask 1046534  }
  0x31   :  { %487 = vmatpush.bf16.msrb.mxu0 %v1183_v23  ;;  %482 = vmatmul.bf16.vlgmr.msra.gmra.mxu3 %v1532_v32  ;;  %v338_v23 = vld [vmem:[%s1668_s6] sm:$0x7]  ;;  %vm730_vm14 = vcmask 1047559  }
  0x32   :  { %297 = vmatpush.bf16.msra.mxu2 %v1031_v47  ;;  %v340_v26 = vperm.slane %v338_v23, 0  ;;  %v341_v45 = vperm.slane %v338_v23, 1  ;;  %v1303_v47 = vld [vmem:[%s1669_s7 + $0x8] sm:$0xff]  ;;  %v342_v63 = vperm.slane %v338_v23, 2 }
  0x33   :  { %287 = vmatmul.bf16.vlgmr.msra.gmra.mxu1 %v1528_v31 }
  0x34   :  { %500 = vmatpush.bf16.msrb.mxu1 %v1187_v33  ;;  %v1308_v33 = vld [vmem:[%s1669_s7 + $0x30] sm:$0xff] }
  0x35   :  { %488 = vmatpush.bf16.msrb.mxu0 %v1171_v36  ;;  %v1307_v36 = vld [vmem:[%s1669_s7 + $0x28] sm:$0xff] }
  0x36   :  { %298 = vmatpush.bf16.msra.mxu2 %v1019_v56  ;;  %v1302_v56 = vld [vmem:[%s1669_s7] sm:$0xff] }
  0x38   :  { %501 = vmatpush.bf16.msrb.mxu1 %v1175_v42 }
  0x39   :  { %489 = vmatpush.bf16.msrb.mxu0 %v1159_v43  ;;  %v133_v43 = vperm.slane %v1543_v21, 1 }
  0x3a   :  { %299 = vmatpush.bf16.msra.mxu2 %v1007_v0 }
  0x3c   :  { %502 = vmatpush.bf16.msrb.mxu1 %v1163_v51 }
  0x3d   :  { %490 = vmatpush.bf16.msrb.mxu0 %v1147_v52  ;;  %300 = vmatmul.bf16.vlgmr.msra.gmra.mxu2 %v1528_v31 }
  0x3e   :  { %630 = vmatpush.bf16.msrb.mxu2 %v1309_v28  ;;  %v1347_v28 = vld [vmem:[%s1670_s8] ss:$0 sm:$0xff] }
  0x40   :  { %503 = vmatpush.bf16.msrb.mxu1 %v1151_v60 }
  0x41   :  { %491 = vmatpush.bf16.msrb.mxu0 %v1135_v61 }
  0x42   :  { %631 = vmatpush.bf16.msrb.mxu2 %v1308_v33 }
  0x44   :  { %504 = vmatpush.bf16.msrb.mxu1 %v1139_v3 }
  0x45   :  { %492 = vmatpush.bf16.msrb.mxu0 %v1123_v4 }
  0x46   :  { %632 = vmatpush.bf16.msrb.mxu2 %v1307_v36 }
  0x48   :  { %505 = vmatpush.bf16.msrb.mxu1 %v1127_v9 }
  0x49   :  { %493 = vmatpush.bf16.msrb.mxu0 %v1111_v10 }
  0x4a   :  { %633 = vmatpush.bf16.msrb.mxu2 %v1306_v38 }
  0x4c   :  { %506 = vmatpush.bf16.msrb.mxu1 %v1115_v15 }
  0x4d   :  { %494 = vmatpush.bf16.msrb.mxu0 %v1099_v17 }
  0x4e   :  { %634 = vmatpush.bf16.msrb.mxu2 %v1305_v41 }
  0x50   :  { %495 = vmatmul.bf16.vlgmr.msrb.gmra.mxu0 %v1532_v32  ;;  %507 = vmatpush.bf16.msrb.mxu1 %v1103_v20 }
  0x52   :  { %635 = vmatpush.bf16.msrb.mxu2 %v1304_v44 }
  0x53   :  { %508 = vmatmul.bf16.vlgmr.msrb.gmra.mxu1 %v1532_v32 }
  0x56   :  { %636 = vmatpush.bf16.msrb.mxu2 %v1303_v47 }
  0x5a   :  { %637 = vmatpush.bf16.msrb.mxu2 %v1302_v56  ;;  %v1614_v56 = vld [vmem:[%s1664_s2 + $0x18] sm:$0xff]  }
  0xad   :  { %v275_v22 = vpop.f32.mrf.mxu0 }
  0xae   :  { %v276_v27 = vadd.f32 %v275_v22, %v132_v24 }
  0xb0   :  { %v288_v25 = vpop.f32.mrf.mxu1 }
  0xb1   :  { %v289_v46 = vadd.f32 %v288_v25, %v133_v43 }
  0xb4   :  { %v483_v29 = vpop.f32.mrf.mxu3 }
  0xb5   :  { %v484_v30 = vadd.f32 %v483_v29, %v340_v26  ;;  %v277_v31 = vpop.f32.mrf.mxu0  ;;  %v1585_v29 = vld [vmem:[%s1664_s2] sm:$0xff]  }
  0xb6   :  { %v1595_v31 = vld [vmem:[%s1664_s2 + $0x8] sm:$0xff]   ;;  %v1320_v33 = vunpack.c.l.bf16 %v1585_v29 }
  0xb7   :  { %v513_v32 = vadd.f32 %v484_v30, %v276_v27 }
  0xb8   :  { %v290_v34 = vpop.f32.mrf.mxu1 }
  0xb9   :  { %v1188_v35 = vmul.f32 -1.442695, %v513_v32 }
  0xbb   :  { %1349 = vpow2.f32 %v1188_v35 }
  0xbc   :  { %v485_v37 = vpop.f32.mrf.mxu3 }
  0xbd   :  { %v1324_v37 = vunpack.c.l.bf16 %v1595_v31 }
  0xc0   :  { %v301_v42 = vpop.f32.mrf.mxu2 }
  0xc1   :  { %v1350_v39 = vpop.eup %1349  ;;  %v302_v9 = vadd.f32 %v301_v42, %v134_v6 }
  0xc2   :  { %v517_v40 = vadd.f32 1.0, %v1350_v39 }
  0xc4   :  { %1351 = vrcp.f32 %v517_v40  ;;  %vm523_vm0 = vweird.f32 %v517_v40  ;;  %v529_v61 = vand.u32 2147483648, %v517_v40  ;;  %v527_v0 = vand.u32 2147483647, %v517_v40 }
  0xc6   :  { %v530_v4 = vor.u32 1.1754944e-38, %v529_v61  ;;  %vm528_vm3 = vcmp.eq.f32.partialorder %v527_v0, 8.507059e+37 }
  0xc8   :  { %v303_v52 = vpop.f32.mrf.mxu2 }
  0xc9   :  { %v1325_v52 = vunpack.c.h.bf16 %v1595_v31 }
  0xca   :  { %v1352_v48 = vpop.eup %1351 }
  0xcb   :  { %v519_v51 = vmul.f32 %v1352_v48, %v517_v40  ;;  %vm524_vm1 = vweird.f32 %v1352_v48 }
  0xcc   :  { %vm525_vm2 = vmor %vm523_vm0, %vm524_vm1  ;;  %vm734_vm0 = vcmask 64512  }
  0xcd   :  { %v496_v49 = vpop.f32.mrf.mxu0  ;;  %v520_v55 = vsub.f32 1.0, %v519_v51 }
  0xce   :  { %v497_v50 = vadd.f32 %v496_v49, %v341_v45 }
  0xcf   :  { %v521_v58 = vmul.f32 %v1352_v48, %v520_v55 }
  0xd0   :  { %v533_v53 = vadd.f32 %v497_v50, %v289_v46  ;;  %v509_v54 = vpop.f32.mrf.mxu1 }
  0xd1   :  { %v522_v60 = vadd.f32 %v1352_v48, %v521_v58  ;;  %v510_v5 = vadd.f32 %v509_v54, %v342_v63 }
  0xd2   :  { %v1189_v57 = vmul.f32 -1.442695, %v533_v53 }
  0xd3   :  { %v526_v3 = vsel %vm525_vm2, %v1352_v48, %v522_v60  ;;  %v1321_v48 = vunpack.c.h.bf16 %v1585_v29  ;;  %v1332_v60 = vunpack.c.l.bf16 %v1614_v56 }
  0xd4   :  { %1353 = vpow2.f32 %v1189_v57  ;;  %v531_v7 = vsel %vm528_vm3, %v530_v4, %v526_v3  ;;  %v699_v3 = vlaneseq }
  0xd5   :  { %v498_v59 = vpop.f32.mrf.mxu0  ;;  %v553_v8 = vmul.f32 %v531_v7, %v510_v5 }
  0xd6   :  { %v700_v6 = vand.u32 127, %v699_v3 }
  0xd7   :  { %v554_v12 = vadd.f32 %v553_v8, %v302_v9 }
  0xd8   :  { %v511_v62 = vpop.f32.mrf.mxu1  ;;  %vm701_vm15 = vcmp.lt.s32.totalorder %v700_v6, 8 }
  0xd9   :  { %v1333_v62 = vunpack.c.h.bf16 %v1614_v56 }
  0xda   :  { %v1354_v1 = vpop.eup %1353 }
  0xdb   :  { %v537_v2 = vadd.f32 1.0, %v1354_v1 }
  0xdd   :  { %1355 = vrcp.f32 %v537_v2  ;;  %v549_v14 = vand.u32 2147483648, %v537_v2  ;;  %v547_v17 = vand.u32 2147483647, %v537_v2  ;;  %vm543_vm5 = vweird.f32 %v537_v2 }
  0xde   :  { %1357 = vtanh.f32 %v554_v12 }
  0xdf   :  { %v550_v19 = vor.u32 1.1754944e-38, %v549_v14  ;;  %vm548_vm7 = vcmp.eq.f32.partialorder %v547_v17, 8.507059e+37 }
  0xe3   :  { %v1356_v10 = vpop.eup %1355 }
  0xe4   :  { %v539_v11 = vmul.f32 %v1356_v10, %v537_v2  ;;  %vm544_vm4 = vweird.f32 %v1356_v10  ;;  %v1358_v23 = vpop.eup %1357 }
  0xe5   :  { %vm545_vm6 = vmor %vm543_vm5, %vm544_vm4 }
  0xe6   :  { %v540_v13 = vsub.f32 1.0, %v539_v11 }
  0xe8   :  { %v541_v15 = vmul.f32 %v1356_v10, %v540_v13 }
  0xea   :  { %v542_v18 = vadd.f32 %v1356_v10, %v541_v15 }
  0xec   :  { %v546_v20 = vsel %vm545_vm6, %v1356_v10, %v542_v18 }
  0xed   :  { %v551_v22 = vsel %vm548_vm7, %v550_v19, %v546_v20 }
  0xee   :  { %v556_v21 = vsub.f32 1.0, %v551_v22  ;;  %v558_v25 = vmul.f32 %v551_v22, %v1523_v16  ;;  %v1590_v16 = vld [vmem:[%s1664_s2 + $0x10] sm:$0xff]  }
  0xef   :  { %v1328_v34 = vunpack.c.l.bf16 %v1590_v16  ;;  %v1329_v50 = vunpack.c.h.bf16 %v1590_v16 }
  0xf0   :  { %v557_v24 = vmul.f32 %v1358_v23, %v556_v21 }
  0xf2   :  { %v559_v26 = vadd.f32 %v558_v25, %v557_v24 }
  0xf4   :  { %560 = vst [vmem:[%s1674_s12] sm:$0xff] %v559_v26  ;;  %v561_v27 = vpack.c.bf16 %v559_v26, %v559_v26 }
  0xf6   :  { %638 = vmatmul.bf16.vlgmr.msrb.gmra.mxu2 %v561_v27 }
 0x179   :  { %v639_v30 = vpop.f32.mrf.mxu2 }
 0x17a   :  { %v640_v32 = vadd.f32 %v1347_v28, %v639_v30 }
 0x17c   :  { %v659_v35 = vperm.slane %v640_v32, 0  ;;  %v647_v36 = vrot.slane %v640_v32, 4  ;;  %v645_v38 = vrot.slane %v640_v32, 2  ;;  %v644_v42 = vrot.slane %v640_v32, 1 }
 0x17d   :  { %v648_v45 = vrot.slane %v640_v32, 5  ;;  %v646_v46 = vrot.slane %v640_v32, 3  ;;  %v649_v55 = vrot.slane %v640_v32, 6  ;;  %v650_v59 = vrot.slane %v640_v32, 7 }
 0x17e   :  { %v675_v39 = vmul.f32 %v1320_v33, %v659_v35  ;;  %v663_v40 = vperm.slane %v647_v36, 0  ;;  %v661_v41 = vperm.slane %v645_v38, 0  ;;  %v660_v49 = vperm.slane %v644_v42, 0 }
 0x17f   :  { %v664_v51 = vperm.slane %v648_v45, 0  ;;  %v662_v53 = vperm.slane %v646_v46, 0  ;;  %v665_v61 = vperm.slane %v649_v55, 0  ;;  %v666_v63 = vperm.slane %v650_v59, 0 }
 0x180   :  { %683 = vadd.xlane.f32.xlu0 %v675_v39  ;;  %v679_v43 = vmul.f32 %v1328_v34, %v663_v40  ;;  %v677_v44 = vmul.f32 %v1324_v37, %v661_v41  ;;  %v676_v54 = vmul.f32 %v1321_v48, %v660_v49  ;;  %v761_v40 = vshrl.u32 %v699_v3, 7  ;;  %v1317_v3 = vld [vmem:[#allocation6 + $0x38] sm:$0xff] }
 0x181   :  { %v641_v47 = vpop.f32.mrf.mxu2  ;;  %v680_v57 = vmul.f32 %v1329_v50, %v664_v51  ;;  %v678_v58 = vmul.f32 %v1325_v52, %v662_v53  ;;  %v681_v0 = vmul.f32 %v1332_v60, %v665_v61  ;;  %v682_v1 = vmul.f32 %v1333_v62, %v666_v63  ;;  %972 = vmatpush.bf16.msrb.mxu3 %v1317_v3 }
 0x182   :  { %691 = vadd.xlane.f32.xlu2 %v679_v43  ;;  %687 = vadd.xlane.f32.xlu1 %v677_v44 }
 0x183   :  { %1346 = vset.pattern.permute.xlu0 %v761_v40  ;;  %1345 = vset.pattern.permute.xlu2 %v761_v40 }
 0x184   :  { %1344 = vset.pattern.permute.xlu1 %v761_v40 }
 0x188   :  { %685 = vadd.xlane.f32.xlu0 %v676_v54 }
 0x18a   :  { %693 = vadd.xlane.f32.xlu2 %v680_v57  ;;  %689 = vadd.xlane.f32.xlu1 %v678_v58 }
 0x190   :  { %695 = vadd.xlane.f32.xlu0 %v681_v0 }
 0x192   :  { %697 = vadd.xlane.f32.xlu1 %v682_v1 }
 0x1f3   :  { %v684_v2 = vpop.xlane.xlu0 %683 }
 0x1f4   :  { %v710_v8 = vperm.slane %v684_v2, %v700_v6 }
 0x1f5   :  { %v688_v4 = vpop.xlane.xlu1 %687  ;;  %v692_v5 = vpop.xlane.xlu2 %691 }
 0x1f6   :  { %v712_v10 = vperm.slane %v688_v4, %v700_v6  ;;  %v714_v15 = vperm.slane %v692_v5, %v700_v6  ;;  %v1316_v5 = vld [vmem:[#allocation6 + $0x30] sm:$0xff] }
 0x1f7   :  { %973 = vmatpush.bf16.msrb.mxu3 %v1316_v5 }
 0x1fb   :  { %v686_v7 = vpop.xlane.xlu0 %685 }
 0x1fc   :  { %v711_v9 = vperm.slane %v686_v7, %v700_v6 }
 0x1fd   :  { %v690_v11 = vpop.xlane.xlu1 %689  ;;  %v694_v17 = vpop.xlane.xlu2 %693 }
 0x1fe   :  { %v719_v12 = vsel %vm718_vm8, %v711_v9, %v710_v8  ;;  %v713_v13 = vperm.slane %v690_v11, %v700_v6  ;;  %v715_v20 = vperm.slane %v694_v17, %v700_v6  ;;  %v1314_v8 = vld [vmem:[#allocation6 + $0x20] sm:$0xff]  ;;  %v1311_v17 = vld [vmem:[#allocation6 + $0x8] sm:$0xff] }
 0x1ff   :  { %v721_v14 = vsel %vm720_vm9, %v712_v10, %v719_v12  ;;  %v1313_v10 = vld [vmem:[#allocation6 + $0x18] sm:$0xff] }
 0x200   :  { %v723_v18 = vsel %vm722_vm10, %v713_v13, %v721_v14  ;;  %v1312_v13 = vld [vmem:[#allocation6 + $0x10] sm:$0xff] }
 0x201   :  { %v725_v19 = vsel %vm724_vm11, %v714_v15, %v723_v18 }
 0x202   :  { %v727_v24 = vsel %vm726_vm12, %v715_v20, %v725_v19 }
 0x203   :  { %v696_v22 = vpop.xlane.xlu0 %695 }
 0x204   :  { %v716_v21 = vperm.slane %v696_v22, %v700_v6 }
 0x205   :  { %v698_v23 = vpop.xlane.xlu1 %697 }
 0x206   :  { %v717_v25 = vperm.slane %v698_v23, %v700_v6  ;;  %v729_v26 = vsel %vm728_vm13, %v716_v21, %v727_v24  ;;  %v1315_v6 = vld [vmem:[#allocation6 + $0x28] sm:$0xff]  ;;  %v1310_v24 = vld [vmem:[#allocation6] sm:$0xff] }
 0x207   :  { %974 = vmatpush.bf16.msrb.mxu3 %v1315_v6 }
 0x208   :  { %v731_v27 = vsel %vm730_vm14, %v717_v25, %v729_v26 }
 0x209   :  { %v733_v28 = vsel %vm701_vm15, %v731_v27, -1e+30 }
 0x20a   :  { %v735_v30 = vsel %vm734_vm0, %v733_v28, -inf }
 0x20b   :  { %736 = vmax.xlane.f32.xlu2 %v735_v30  ;;  %975 = vmatpush.bf16.msrb.mxu3 %v1314_v8 }
 0x20f   :  { %976 = vmatpush.bf16.msrb.mxu3 %v1313_v10 }
 0x213   :  { %977 = vmatpush.bf16.msrb.mxu3 %v1312_v13 }
 0x217   :  { %978 = vmatpush.bf16.msrb.mxu3 %v1311_v17 }
 0x21b   :  { %979 = vmatpush.bf16.msrb.mxu3 %v1310_v24 }
 0x27e   :  { %v737_v32 = vpop.xlane.xlu2 %736 }
 0x27f   :  { %v738_v35 = vsub.f32 %v733_v28, %v737_v32 }
 0x281   :  { %v739_v36 = vmul.f32 1.442695, %v738_v35 }
 0x283   :  { %1359 = vpow2.f32 %v739_v36 }
 0x289   :  { %v1360_v38 = vpop.eup %1359 }
 0x28a   :  { %v741_v39 = vsel %vm734_vm0, %v1360_v38, 0.0 }
 0x28b   :  { %742 = vadd.xlane.f32.xlu0 %v741_v39 }
 0x2fe   :  { %v743_v41 = vpop.xlane.xlu0 %742 }
 0x2ff   :  { %1361 = vrcp.f32 %v743_v41  ;;  %v755_v45 = vand.u32 2147483648, %v743_v41  ;;  %v753_v47 = vand.u32 2147483647, %v743_v41  ;;  %vm749_vm2 = vweird.f32 %v743_v41 }
 0x301   :  { %v756_v51 = vor.u32 1.1754944e-38, %v755_v45  ;;  %vm754_vm4 = vcmp.eq.f32.partialorder %v753_v47, 8.507059e+37 }
 0x305   :  { %v1362_v42 = vpop.eup %1361 }
 0x306   :  { %v745_v43 = vmul.f32 %v1362_v42, %v743_v41  ;;  %vm750_vm1 = vweird.f32 %v1362_v42 }
 0x307   :  { %vm751_vm3 = vmor %vm749_vm2, %vm750_vm1 }
 0x308   :  { %v746_v44 = vsub.f32 1.0, %v745_v43 }
 0x30a   :  { %v747_v46 = vmul.f32 %v1362_v42, %v746_v44 }
 0x30c   :  { %v748_v49 = vadd.f32 %v1362_v42, %v747_v46 }
 0x30e   :  { %v752_v53 = vsel %vm751_vm3, %v1362_v42, %v748_v49 }
 0x30f   :  { %v757_v54 = vsel %vm754_vm4, %v756_v51, %v752_v53 }
 0x310   :  { %v758_v55 = vmul.f32 %v1360_v38, %v757_v54 }
 0x312   :  { %v773_v57 = vperm.slane %v758_v55, 2  ;;  %v766_v58 = vperm.slane %v758_v55, 1  ;;  %v759_v59 = vperm.slane %v758_v55, 0  ;;  %v780_v61 = vperm.slane %v758_v55, 3 }
 0x313   :  { %v787_v63 = vperm.slane %v758_v55, 4  ;;  %v794_v0 = vperm.slane %v758_v55, 5  ;;  %v801_v1 = vperm.slane %v758_v55, 6  ;;  %v808_v2 = vperm.slane %v758_v55, 7 }
 0x314   :  { %778 = vperm.xlu0 %1346, %v773_v57   ;;  %771 = vperm.xlu2 %1345, %v766_v58  }
 0x315   :  { %764 = vperm.xlu1 %1344, %v759_v59  }
 0x31c   :  { %785 = vperm.xlu2 %1345, %v780_v61  }
 0x31d   :  { %792 = vperm.xlu1 %1344, %v787_v63  }
 0x324   :  { %799 = vperm.xlu2 %1345, %v794_v0  }
 0x325   :  { %806 = vperm.xlu1 %1344, %v801_v1  }
 0x32c   :  { %813 = vperm.xlu2 %1345, %v808_v2  }
 0x36e   :  { %v772_v4 = vpop.permute.xlu2 %771 }
 0x36f   :  { %v816_v9 = vmul.f32 %v1321_v48, %v772_v4 }
 0x371   :  { %v829_v12 = vrot.slane %v816_v9, 4 }
 0x373   :  { %v830_v15 = vadd.f32 %v829_v12, %v816_v9 }
 0x375   :  { %v831_v25 = vrot.slane %v830_v15, 2 }
 0x376   :  { %v786_v7 = vpop.permute.xlu2 %785 }
 0x377   :  { %v818_v14 = vmul.f32 %v1325_v52, %v786_v7  ;;  %v832_v35 = vadd.f32 %v831_v25, %v830_v15 }
 0x379   :  { %v841_v20 = vrot.slane %v818_v14, 4  ;;  %v833_v42 = vrot.slane %v832_v35, 1 }
 0x37b   :  { %v842_v28 = vadd.f32 %v841_v20, %v818_v14  ;;  %v834_v53 = vadd.f32 %v833_v42, %v832_v35 }
 0x37d   :  { %v843_v38 = vrot.slane %v842_v28, 2 }
 0x37e   :  { %v800_v11 = vpop.permute.xlu2 %799 }
 0x37f   :  { %v820_v22 = vmul.f32 %v1329_v50, %v800_v11  ;;  %v844_v46 = vadd.f32 %v843_v38, %v842_v28 }
 0x381   :  { %v853_v30 = vrot.slane %v820_v22, 4  ;;  %v845_v58 = vrot.slane %v844_v46, 1 }
 0x383   :  { %v854_v39 = vadd.f32 %v853_v30, %v820_v22  ;;  %v846_v5 = vadd.f32 %v845_v58, %v844_v46 }
 0x385   :  { %v855_v47 = vrot.slane %v854_v39, 2  ;;  %v874_v15 = vpack.c.bf16 %v846_v5, %v846_v5 }
 0x386   :  { %v779_v18 = vpop.permute.xlu0 %778  ;;  %v814_v19 = vpop.permute.xlu2 %813 }
 0x387   :  { %v817_v48 = vmul.f32 %v1324_v37, %v779_v18  ;;  %v765_v21 = vpop.permute.xlu1 %764  ;;  %v822_v26 = vmul.f32 %v1333_v62, %v814_v19  ;;  %v856_v59 = vadd.f32 %v855_v47, %v854_v39 }
 0x388   :  { %v815_v23 = vmul.f32 %v1320_v33, %v765_v21 }
 0x389   :  { %v835_v52 = vrot.slane %v817_v48, 4  ;;  %v865_v37 = vrot.slane %v822_v26, 4  ;;  %v857_v6 = vrot.slane %v856_v59, 1 }
 0x38a   :  { %v823_v27 = vrot.slane %v815_v23, 4 }
 0x38b   :  { %v836_v32 = vadd.f32 %v835_v52, %v817_v48  ;;  %v866_v62 = vadd.f32 %v865_v37, %v822_v26  ;;  %v858_v17 = vadd.f32 %v857_v6, %v856_v59  ;;  %v910_v48 = vunpack.c.l.b16 %v874_v15  ;;  %v1348_v37 = vld [vmem:[%s1672_s10] ss:$0 sm:$0xff] }
 0x38c   :  { %v824_v50 = vadd.f32 %v823_v27, %v815_v23 }
 0x38d   :  { %v837_v31 = vrot.slane %v836_v32, 2  ;;  %v867_v54 = vrot.slane %v866_v62, 2  ;;  %v876_v21 = vpack.c.bf16 %v858_v17, %v858_v17 }
 0x38e   :  { %v825_v36 = vrot.slane %v824_v50, 2 }
 0x38f   :  { %v838_v29 = vadd.f32 %v837_v31, %v836_v32  ;;  %v793_v33 = vpop.permute.xlu1 %792  ;;  %v868_v1 = vadd.f32 %v867_v54, %v866_v62  ;;  %v912_v27 = vunpack.c.l.b16 %v876_v21 }
 0x390   :  { %v826_v40 = vadd.f32 %v825_v36, %v824_v50  ;;  %v819_v41 = vmul.f32 %v1328_v34, %v793_v33  ;;  %v872_v34 = vpack.c.bf16 %v834_v53, %v834_v53 }
 0x391   :  { %v839_v43 = vrot.slane %v838_v29, 1  ;;  %v869_v11 = vrot.slane %v868_v1, 1 }
 0x392   :  { %v827_v44 = vrot.slane %v826_v40, 1  ;;  %v847_v45 = vrot.slane %v819_v41, 4  ;;  %v908_v10 = vunpack.c.l.b16 %v872_v34 }
 0x393   :  { %v840_v55 = vadd.f32 %v839_v43, %v838_v29  ;;  %v870_v18 = vadd.f32 %v869_v11, %v868_v1 }
 0x394   :  { %v828_v49 = vadd.f32 %v827_v44, %v826_v40  ;;  %v848_v51 = vadd.f32 %v847_v45, %v819_v41 }
 0x395   :  { %v873_v2 = vpack.c.bf16 %v840_v55, %v840_v55  ;;  %v878_v24 = vpack.c.bf16 %v870_v18, %v870_v18 }
 0x396   :  { %v849_v57 = vrot.slane %v848_v51, 2  ;;  %v871_v61 = vpack.c.bf16 %v828_v49, %v828_v49 }
 0x397   :  { %v807_v63 = vpop.permute.xlu1 %806  ;;  %v909_v12 = vunpack.c.l.b16 %v873_v2  ;;  %v914_v30 = vunpack.c.l.b16 %v878_v24 }
 0x398   :  { %v850_v0 = vadd.f32 %v849_v57, %v848_v51  ;;  %v821_v16 = vmul.f32 %v1332_v60, %v807_v63  ;;  %v907_v7 = vunpack.c.l.b16 %v871_v61 }
 0x39a   :  { %v851_v3 = vrot.slane %v850_v0, 1  ;;  %v859_v4 = vrot.slane %v821_v16, 4  ;;  %v915_v56 = vsel %vm718_vm8, %v908_v10, %v907_v7 }
 0x39b   :  { %v916_v19 = vsel %vm720_vm9, %v909_v12, %v915_v56 }
 0x39c   :  { %v852_v8 = vadd.f32 %v851_v3, %v850_v0  ;;  %v860_v9 = vadd.f32 %v859_v4, %v821_v16  ;;  %v917_v25 = vsel %vm722_vm10, %v910_v48, %v916_v19 }
 0x39e   :  { %v875_v13 = vpack.c.bf16 %v852_v8, %v852_v8  ;;  %v861_v14 = vrot.slane %v860_v9, 2 }
 0x3a0   :  { %v862_v60 = vadd.f32 %v861_v14, %v860_v9  ;;  %v911_v20 = vunpack.c.l.b16 %v875_v13 }
 0x3a2   :  { %v863_v22 = vrot.slane %v862_v60, 1  ;;  %v918_v26 = vsel %vm724_vm11, %v911_v20, %v917_v25 }
 0x3a3   :  { %v919_v32 = vsel %vm726_vm12, %v912_v27, %v918_v26 }
 0x3a4   :  { %v864_v23 = vadd.f32 %v863_v22, %v862_v60 }
 0x3a6   :  { %v877_v52 = vpack.c.bf16 %v864_v23, %v864_v23 }
 0x3a8   :  { %v913_v28 = vunpack.c.l.b16 %v877_v52 }
 0x3aa   :  { %v920_v50 = vsel %vm728_vm13, %v913_v28, %v919_v32 }
 0x3ab   :  { %v921_v35 = vsel %vm730_vm14, %v914_v30, %v920_v50 }
 0x3ac   :  { %v922_v31 = vpack.c.b16 %v921_v35, %v921_v35 }
 0x3ae   :  { %980 = vmatmul.bf16.vlgmr.msrb.gmra.mxu3 %v922_v31 }
 0x431   :  { %v981_v36 = vpop.f32.mrf.mxu3 }
 0x432   :  { %v982_v38 = vadd.f32 %v1348_v37, %v981_v36 }
 0x434   :  { %985 = vst [vmem:[%s1673_s11] sm:$0xff] %v982_v38 }
 0x439   :  { %v983_v39 = vpop.f32.mrf.mxu3 }
 0x43a   :  { %994 = vsyncpa [#allocation3], 1 }
 0x43b   :  { %995 = vsyncpa [#allocation5], 1 }

</bundles_post_ra>
